<compile_context>
chip_gen: v7x
topology: tpu7x:2x2x1
jax: 0.10.0
libtpu: 0.0.40
codegen_flags: <defaults>
</compile_context>

<pallas_src>
import jax
import jax.numpy as jnp
from jax.experimental import pallas as pl
from jax.experimental.pallas import tpu as pltpu


def _round_up(a, m):
    return ((a + m - 1) // m) * m


def _linear_kernel_acc(x_ref, w_ref, b_ref, o_ref):
    """3-D grid (M, N, K-innermost). Output block is K-resident: accumulate in place."""
    k = pl.program_id(2)

    @pl.when(k == 0)
    def _():
        # Fold bias into the accumulator init (saves an epilogue add + copy).
        o_ref[...] = jnp.broadcast_to(b_ref[...], o_ref.shape)

    o_ref[...] += jnp.dot(x_ref[...], w_ref[...],
                          preferred_element_type=jnp.float32)


def _linear_kernel_single_k(x_ref, w_ref, b_ref, o_ref):
    """2-D grid: the whole contraction fits in one tile -- no k axis, no gating."""
    o_ref[...] = jnp.dot(x_ref[...], w_ref[...],
                         preferred_element_type=jnp.float32) + b_ref[...]


def fully_connected(x, weight, bias, *, precision="float32", force_pallas=False):
    """y = x @ weight.T + bias, matching torch.nn.Linear.

    x:      (B, in_features)             float32
    weight: (out_features, in_features)  float32 (torch layout)
    bias:   (out_features,)              float32
    precision: "float32" (exact, default) or "bfloat16" (bf16 operands,
               f32 accumulation -- faster on v6e/v7x, slightly lower precision)
    returns (B, out_features)            float32
    """
    B, K = x.shape
    N, Kw = weight.shape
    assert K == Kw, "in_features mismatch"
    assert bias.shape == (N,)

    # ---- Tiny-shape fast path ------------------------------------------------
    # For micro shapes (like the 8x15->10 module spec), padding K/N up to 128
    # multiples does >50x the useful FLOPs and the fixed pallas_call/grid
    # overhead dominates; XLA's fused dot is strictly faster on all generations.
    if not force_pallas and (B * K * N) < (1 << 20):
        return x @ weight.T + bias

    use_bf16 = precision == "bfloat16"
    in_dtype = jnp.bfloat16 if use_bf16 else jnp.float32
    in_bytes = 2 if use_bf16 else 4

    # ---- Generation-aware VMEM budget -----------------------------------------
    try:
        vmem_phys = pltpu.get_tpu_info().vmem_capacity_bytes
    except Exception:  # conservative fallback sized for v7x (64 MiB / TC)
        vmem_phys = 64 * 1024 * 1024
    vmem_budget = (vmem_phys * 3) // 4  # ~48 MiB on v7x, ~96 MiB on v5e/v6e

    # ---- Tile selection: MXU/vreg aligned, as large as the budget allows ------
    tm = min(512, _round_up(B, 8))
    tn = min(1024, _round_up(N, 128))
    tk = min(2048 if use_bf16 else 1024, _round_up(K, 128))

    def footprint(tm_, tn_, tk_):
        # double-buffered x & w input tiles + double-buffered f32 output tile
        # + small bias tile.
        return (2 * (tm_ * tk_ + tk_ * tn_) * in_bytes
                + 2 * tm_ * tn_ * 4 + tn_ * 4)

    def shrink_128(v):
        return max(128, ((v // 2) // 128) * 128)

    while footprint(tm, tn, tk) > vmem_budget and (tk > 128 or tn > 128 or tm > 8):
        if tk > 128:
            tk = shrink_128(tk)
        elif tn > 128:
            tn = shrink_128(tn)
        else:
            tm = max(8, ((tm // 2) // 8) * 8)

    Mp, Np, Kp = _round_up(B, tm), _round_up(N, tn), _round_up(K, tk)

    # v7x has two TensorCores: make sure the "parallel" part of the grid has at
    # least two blocks to shard whenever the problem is big enough.
    if (Mp // tm) * (Np // tn) == 1:
        if tn >= 256 and (tn // 2) % 128 == 0:
            tn //= 2
        elif tm >= 16 and (tm // 2) % 8 == 0:
            tm //= 2

    gm, gn, gk = Mp // tm, Np // tn, Kp // tk

    # ---- Operand prep (wrapper-side, one-time, fusible by XLA) ----------------
    # Weight goes to (K, N) once so the kernel contracts canonically on the MXU.
    wt = weight.T
    xp = x if (Mp == B and Kp == K) else jnp.pad(x, ((0, Mp - B), (0, Kp - K)))
    wp = wt if (Kp == K and Np == N) else jnp.pad(wt, ((0, Kp - K), (0, Np - N)))
    bp = bias.reshape(1, N)
    if Np != N:
        bp = jnp.pad(bp, ((0, 0), (0, Np - N)))
    xp = xp.astype(in_dtype)
    wp = wp.astype(in_dtype)
    bp = bp.astype(jnp.float32)  # bias stays f32; added in f32

    if gk == 1:
        kernel = _linear_kernel_single_k
        grid = (gm, gn)
        in_specs = [
            pl.BlockSpec((tm, tk), lambda i, j: (i, 0)),   # x tile
            pl.BlockSpec((tk, tn), lambda i, j: (0, j)),   # W^T tile (K, N)
            pl.BlockSpec((1, tn), lambda i, j: (0, j)),    # bias tile
        ]
        out_specs = pl.BlockSpec((tm, tn), lambda i, j: (i, j))
        dims = ("parallel", "parallel")
    else:
        kernel = _linear_kernel_acc
        grid = (gm, gn, gk)
        in_specs = [
            pl.BlockSpec((tm, tk), lambda i, j, k: (i, k)),   # x tile
            pl.BlockSpec((tk, tn), lambda i, j, k: (k, j)),   # W^T tile (K, N)
            # bias index is k-independent -> copied once per (i, j), used at k==0
            pl.BlockSpec((1, tn), lambda i, j, k: (0, j)),
        ]
        out_specs = pl.BlockSpec((tm, tn), lambda i, j, k: (i, j))
        dims = ("parallel", "parallel", "arbitrary")

    # TODO(synk): if xprof shows exposed W DMA on v5e (~820 GB/s HBM), set
    # pipeline_mode=pl.Buffered(3) on the weight BlockSpec within the VMEM budget.

    out = pl.pallas_call(
        kernel,
        out_shape=jax.ShapeDtypeStruct((Mp, Np), jnp.float32),
        grid_spec=pltpu.PrefetchScalarGridSpec(
            num_scalar_prefetch=0,
            grid=grid,
            in_specs=in_specs,
            out_specs=out_specs,
        ),
        compiler_params=pltpu.CompilerParams(
            dimension_semantics=dims,
            vmem_limit_bytes=int(vmem_budget),
        ),
        cost_estimate=pl.CostEstimate(
            flops=2 * B * K * N,
            transcendentals=0,
            bytes_accessed=in_bytes * (B * K + K * N) + 4 * (B * N + N),
        ),
    )(xp, wp, bp)

    if Mp != B or Np != N:
        out = out[:B, :N]
    return out


if __name__ == "__main__":
    key = jax.random.PRNGKey(0)
    kx, kw, kb, kx2, kw2, kb2 = jax.random.split(key, 6)

    # --- Module-spec shapes: in_features=15, out_features=10, batch=8 ----------
    in_features, out_features, batch = 15, 10, 8
    bound = 1.0 / (in_features ** 0.5)
    x = jax.random.normal(kx, (batch, in_features), dtype=jnp.float32)
    w = jax.random.uniform(kw, (out_features, in_features),
                           minval=-bound, maxval=bound, dtype=jnp.float32)
    b = jax.random.uniform(kb, (out_features,),
                           minval=-bound, maxval=bound, dtype=jnp.float32)
    y_ref = x @ w.T + b

    y_fast = jax.block_until_ready(fully_connected(x, w, b))                      # fast path
    y_kern = jax.block_until_ready(fully_connected(x, w, b, force_pallas=True))   # kernel path
    assert y_fast.shape == (batch, out_features)
    assert y_kern.shape == (batch, out_features)
    assert jnp.allclose(y_fast, y_ref, atol=1e-5, rtol=1e-5)
    assert jnp.allclose(y_kern, y_ref, atol=1e-5, rtol=1e-5)

    # --- Larger shape: f32 exercises the 3-D accumulation grid (1,2,2); bf16
    #     exercises the 2-D single-K grid; both have >=2 parallel blocks --------
    B2, K2, N2 = 256, 2048, 1024
    x2 = jax.random.normal(kx2, (B2, K2), dtype=jnp.float32)
    w2 = jax.random.normal(kw2, (N2, K2), dtype=jnp.float32) * 0.02
    b2 = jax.random.normal(kb2, (N2,), dtype=jnp.float32) * 0.02
    y2_ref = x2 @ w2.T + b2

    y2 = jax.block_until_ready(fully_connected(x2, w2, b2))
    assert y2.shape == (B2, N2)
    assert jnp.allclose(y2, y2_ref, atol=2e-3, rtol=2e-3)

    y2_bf16 = jax.block_until_ready(fully_connected(x2, w2, b2, precision="bfloat16"))
    assert y2_bf16.shape == (B2, N2)
    assert jnp.allclose(y2_bf16, y2_ref, atol=5e-2, rtol=5e-2)

    print("KERNEL_OK")
</pallas_src>

<mosaic_0001>
module attributes {stable_mosaic.version = 11 : i64} {
  func.func @_linear_kernel_single_k(%arg0: i32, %arg1: i32, %arg2: memref<8x128xf32, #tpu.memory_space<vmem>>, %arg3: memref<128x128xf32, #tpu.memory_space<vmem>>, %arg4: memref<1x128xf32, #tpu.memory_space<vmem>>, %arg5: memref<8x128xf32, #tpu.memory_space<vmem>>) attributes {dimension_semantics = [#tpu.dimension_semantics<parallel>, #tpu.dimension_semantics<parallel>], iteration_bounds = array<i64: 1, 1>, scalar_prefetch = 0 : i64, scratch_operands = 0 : i64, tpu.core_type = #tpu.core_type<tc>, window_params = [{transform_indices = @transform_0, window_bounds = array<i64: 8, 128>}, {transform_indices = @transform_1, window_bounds = array<i64: 128, 128>}, {transform_indices = @transform_2, window_bounds = array<i64: 1, 128>}, {transform_indices = @transform_3, window_bounds = array<i64: 8, 128>}]} {
    %c0 = arith.constant 0 : index
    %c0_0 = arith.constant 0 : index
    %0 = vector.load %arg2[%c0, %c0_0] : memref<8x128xf32, #tpu.memory_space<vmem>>, vector<8x128xf32>
    %c0_1 = arith.constant 0 : index
    %c0_2 = arith.constant 0 : index
    %1 = vector.load %arg3[%c0_1, %c0_2] : memref<128x128xf32, #tpu.memory_space<vmem>>, vector<128x128xf32>
    %cst = arith.constant dense<0.000000e+00> : vector<8x128xf32>
    %2 = tpu.matmul %0, %1, %cst {dimension_numbers = #tpu.dot_dimension_numbers<[1], [0], [0], [1], [0, 0, 1, 1], [], []>} : vector<8x128xf32>, vector<128x128xf32>, vector<8x128xf32> -> vector<8x128xf32>
    %c0_3 = arith.constant 0 : index
    %c0_4 = arith.constant 0 : index
    %3 = vector.load %arg4[%c0_3, %c0_4] : memref<1x128xf32, #tpu.memory_space<vmem>>, vector<1x128xf32>
    %4 = vector.broadcast %3 : vector<1x128xf32> to vector<8x128xf32>
    %5 = arith.addf %2, %4 : vector<8x128xf32>
    %c0_5 = arith.constant 0 : index
    %c0_6 = arith.constant 0 : index
    %6 = vector.load %arg5[%c0_5, %c0_6] : memref<8x128xf32, #tpu.memory_space<vmem>>, vector<8x128xf32>
    tpu.vector_store %arg5[%c0_5, %c0_6], %5 {strides = array<i32>} : memref<8x128xf32, #tpu.memory_space<vmem>>, vector<8x128xf32>,
    return
  }
  func.func @transform_0(%arg0: i32, %arg1: i32) -> (i32, i32) {
    %c0_i32 = arith.constant 0 : i32
    %c0_i32_0 = arith.constant 0 : i32
    return %arg0, %c0_i32 : i32, i32
  }
  func.func @transform_1(%arg0: i32, %arg1: i32) -> (i32, i32) {
    %c0_i32 = arith.constant 0 : i32
    %c0_i32_0 = arith.constant 0 : i32
    return %c0_i32, %arg1 : i32, i32
  }
  func.func @transform_2(%arg0: i32, %arg1: i32) -> (i32, i32) {
    %c0_i32 = arith.constant 0 : i32
    %c0_i32_0 = arith.constant 0 : i32
    return %c0_i32, %arg1 : i32, i32
  }
  func.func @transform_3(%arg0: i32, %arg1: i32) -> (i32, i32) {
    %c0_i32 = arith.constant 0 : i32
    return %arg0, %arg1 : i32, i32
  }
}

</mosaic_0001>

<bundles_post_ra>
// kernel: tpu_custom_call.1
= control target key start
LH: loop header
LB: loop body
LE: loop exit
PB: predicated region body
PF: predicated region fallthrough
CT: control target
= control target key end

     0   :  { %8 = vsyncpa [#allocation3], 0  ;;  %s383_s0 = inlined_call_operand.hbm [shape: f32[8,128], index: 0, kind: input, shape index: {}]   ;;  %s384_s1 = inlined_call_operand.hbm [shape: f32[128,128], index: 1, kind: input, shape index: {}]   ;;  %s385_s2 = inlined_call_operand.vmem [shape: f32[1,128], index: 2, kind: input, shape index: {}]   ;;  %s386_s3 = inlined_call_operand.hbm [shape: f32[8,128], index: 3, kind: output, shape index: {}]  }
   0x1   :  { %9 = vsyncpa [#allocation6], 0 }
   0x2   :  { %10 = vsyncpa [#allocation4], 0  ;;  %s309_s12 = smov [#allocation2]   ;;  %s310_s14 = smov [#allocation5]  }
   0x3   :  { %s17_s13 = sshll.u32 %s309_s12, 4  ;;  %s26_s15 = sshll.u32 %s310_s14, 4  ;;  %s18_s13 = int_to_ptr.vmem [resolvable:$true] %s17_s13  ;;  %s337_s15 = int_to_ptr.vmem [resolvable:$true] %s26_s15 }
   0x4   :  { %s237_s18 = scalar_lea.hbm %s383_s0, 128 }
   0x5   :  { %p238_p0 = scmp.ne.s32.totalorder %s383_s0, %s237_s18  ;;  %p241_p1 = scmp.lt.u32.totalorder %s237_s18, %s383_s0 }
   0x7   :  { %p243_p2 = pnand %p241_p1, %p238_p0 }
   0x9   :  { %246 = shalt.err (!%p243_p2)
}
   0xa   :  { %s247_s23 = scalar_lea.vmem %s18_s13, 128  ;;  %p252_p4 = scmp.lt.s32.totalorder %s18_s13, %s18_s13 }
   0xb   :  { %p248_p3 = scmp.ne.s32.totalorder %s18_s13, %s247_s23  ;;  %p253_p5 = scmp.lt.s32.totalorder %s247_s23, %s247_s23 }
   0xd   :  { %p254_p6 = por %p253_p5, %p252_p4 }
   0xf   :  { %p255_p7 = pnand %p254_p6, %p248_p3 }
  0x11   :  { %258 = shalt.err (!%p255_p7)
}
  0x12   :  { %20 = dma.hbm_to_vmem [thread:$0]  %s383_s0, 128, %s18_s13, [#allocation3]  }
  0x13   :  { %s259_s28 = scalar_lea.hbm %s384_s1, 2048 }
  0x14   :  { %p260_p8 = scmp.ne.s32.totalorder %s384_s1, %s259_s28  ;;  %p263_p9 = scmp.lt.u32.totalorder %s259_s28, %s384_s1 }
  0x16   :  { %p265_p10 = pnand %p263_p9, %p260_p8 }
  0x18   :  { %268 = shalt.err (!%p265_p10)
}
  0x19   :  { %s269_s6 = scalar_lea.vmem %s337_s15, 2048  ;;  %p274_p12 = scmp.lt.s32.totalorder %s337_s15, %s337_s15 }
  0x1a   :  { %p270_p11 = scmp.ne.s32.totalorder %s337_s15, %s269_s6  ;;  %p275_p13 = scmp.lt.s32.totalorder %s269_s6, %s269_s6 }
  0x1c   :  { %p276_p0 = por %p275_p13, %p274_p12 }
  0x1e   :  { %p277_p1 = pnand %p276_p0, %p270_p11 }
  0x20   :  { %280 = shalt.err (!%p277_p1)
}
  0x21   :  { %s311_s0 = smov 128   ;;  %s312_s7 = smov 8  }
  0x22   :  { %32 = dma.hbm_to_vmem [thread:$0]  %s384_s1, 2048, %s337_s15, [#allocation6], %s311_s0, %s311_s0, %s312_s7  }
  0x23   :  { %303 = dma.done.wait [#allocation3], 128  }
  0x24   :  { %304 = vsyncadd [#allocation3], 4294967168 }
  0x25   :  { %305 = dma.done.wait [#allocation6], 2048  }
  0x26   :  { %306 = vsyncadd [#allocation6], 4294965248  ;;  %v313_v0 = vmov 0.0|0.0   ;;  %vm314_vm0 = vmmov 0   ;;  %v315_v1 = vmov 0.0   ;;  %v42_v2 = vld [vmem:[#allocation5] sm:$0xff] }
  0x27   :  { %205 = vmatprep.subr.bf16.mxu0 %v313_v0  ;;  %202 = vmatprep.mubr.msk.f32.mxu0 %vm314_vm0, %v315_v1  ;;  %v43_v3 = vld [vmem:[#allocation5 + $0x8] sm:$0xff]  ;;  %v44_v4 = vld [vmem:[#allocation5 + $0x10] sm:$0xff]  ;;  %v45_v6 = vld [vmem:[#allocation5 + $0x18] sm:$0xff]  ;;  %s316_s11 = smov [#allocation7]  }
  0x28   :  { %v206_v5 = vpack.c.bf16 %v43_v3, %v42_v2  ;;  %v209_v7 = vpack.c.bf16 %v45_v6, %v44_v4  ;;  %v46_v8 = vld [vmem:[#allocation5 + $0x20] sm:$0xff]  ;;  %v47_v9 = vld [vmem:[#allocation5 + $0x28] sm:$0xff]  ;;  %v48_v11 = vld [vmem:[#allocation5 + $0x30] sm:$0xff]  ;;  %s142_s12 = sshll.u32 %s316_s11, 4  ;;  %s143_s12 = int_to_ptr.vmem [resolvable:$true] %s142_s12 }
  0x29   :  { %v212_v10 = vpack.c.bf16 %v47_v9, %v46_v8  ;;  %v49_v12 = vld [vmem:[#allocation5 + $0x38] sm:$0xff]  ;;  %v50_v14 = vld [vmem:[#allocation5 + $0x40] sm:$0xff]  ;;  %v51_v15 = vld [vmem:[#allocation5 + $0x48] sm:$0xff]  ;;  %s281_s13 = scalar_lea.vmem %s143_s12, 128  ;;  %p286_p3 = scmp.lt.s32.totalorder %s143_s12, %s143_s12 }
  0x2a   :  { %207 = vmatpush3.bf16.msra.mxu0 %v206_v5  ;;  %v215_v13 = vpack.c.bf16 %v49_v12, %v48_v11  ;;  %v218_v16 = vpack.c.bf16 %v51_v15, %v50_v14  ;;  %v52_v17 = vld [vmem:[#allocation5 + $0x50] sm:$0xff]  ;;  %v53_v18 = vld [vmem:[#allocation5 + $0x58] sm:$0xff]  ;;  %v54_v20 = vld [vmem:[#allocation5 + $0x60] sm:$0xff]  ;;  %p282_p2 = scmp.ne.s32.totalorder %s143_s12, %s281_s13  ;;  %p287_p4 = scmp.lt.s32.totalorder %s281_s13, %s281_s13 }
  0x2b   :  { %208 = vmatprep.subr.bf16.mxu0 %v313_v0  ;;  %v221_v19 = vpack.c.bf16 %v53_v18, %v52_v17  ;;  %v55_v21 = vld [vmem:[#allocation5 + $0x68] sm:$0xff]  ;;  %v56_v23 = vld [vmem:[#allocation5 + $0x70] sm:$0xff]  ;;  %v57_v24 = vld [vmem:[#allocation5 + $0x78] sm:$0xff] }
  0x2c   :  { %v224_v22 = vpack.c.bf16 %v55_v21, %v54_v20  ;;  %v227_v25 = vpack.c.bf16 %v57_v24, %v56_v23  ;;  %v41_v26 = vld [vmem:[#allocation2] sm:$0xff]  ;;  %p288_p5 = por %p287_p4, %p286_p3 }
  0x2d   :  { %v152_v27 = vld [vmem:[%s385_s2] ss:$0 sm:$0xff] }
  0x2e   :  { %210 = vmatpush3.bf16.msra.mxu0 %v209_v7  ;;  %p289_p6 = pnand %p288_p5, %p282_p2 }
  0x2f   :  { %211 = vmatprep.subr.bf16.mxu0 %v313_v0 }
  0x32   :  { %213 = vmatpush3.bf16.msra.mxu0 %v212_v10 }
  0x33   :  { %214 = vmatprep.subr.bf16.mxu0 %v313_v0 }
  0x36   :  { %216 = vmatpush3.bf16.msra.mxu0 %v215_v13 }
  0x37   :  { %217 = vmatprep.subr.bf16.mxu0 %v313_v0 }
  0x3a   :  { %219 = vmatpush3.bf16.msra.mxu0 %v218_v16 }
  0x3b   :  { %220 = vmatprep.subr.bf16.mxu0 %v313_v0 }
  0x3e   :  { %222 = vmatpush3.bf16.msra.mxu0 %v221_v19 }
  0x3f   :  { %223 = vmatprep.subr.bf16.mxu0 %v313_v0 }
  0x42   :  { %225 = vmatpush3.bf16.msra.mxu0 %v224_v22 }
  0x43   :  { %226 = vmatprep.subr.bf16.mxu0 %v313_v0 }
  0x46   :  { %228 = vmatpush3.bf16.msra.mxu0 %v227_v25 }
  0x49   :  { %203 = vmatmul.mubr.f32.vlgmr.msra.gmra.mrb[0].mxu0 %v41_v26 }
 0x11c   :  { %v131_v28 = vpop.f32.mrb[0].mxu0 }
 0x11d   :  { %v132_v29 = vadd.f32 %v152_v27, %v131_v28  ;;  %v204_v30 = vpop.f32.mrb[1].mxu0 }
 0x11f   :  { %135 = vst [vmem:[#allocation7] sm:$0xff] %v132_v29 }
 0x120   :  { %292 = shalt.err (!%p289_p6)
}
 0x121   :  { %s293_s16 = scalar_lea.hbm %s386_s3, 128 }
 0x122   :  { %p294_p7 = scmp.ne.s32.totalorder %s386_s3, %s293_s16  ;;  %p297_p8 = scmp.lt.u32.totalorder %s293_s16, %s386_s3 }
 0x124   :  { %p299_p9 = pnand %p297_p8, %p294_p7 }
 0x126   :  { %302 = shalt.err (!%p299_p9)
}
 0x127   :  { %145 = dma.vmem_to_hbm [thread:$0]  %s143_s12, 128, %s386_s3, [#allocation4]  }
 0x128   :  { %307 = dma.done.wait [#allocation4], 128  }
 0x129   :  { %308 = vsyncadd [#allocation4], 4294967168 }
 0x12a   :  { %149 = vsyncpa [#allocation3], 1 }
 0x12b   :  { %150 = vsyncpa [#allocation6], 1 }
 0x12c   :  { %151 = vsyncpa [#allocation4], 1 }

</bundles_post_ra>
